<compile_context>
chip_gen: v7x
topology: tpu7x:2x2x1
jax: 0.10.0
libtpu: 0.0.40
codegen_flags: <defaults>
</compile_context>

<pallas_src>
import jax
import jax.numpy as jnp
import numpy as np
from jax.experimental import pallas as pl
from jax.experimental.pallas import tpu as pltpu


def _make_dilconv_kernel(N, C_in, C_out, K, dilation, Wp, span):
    """Builds the single-step DilConv kernel body (stride-1 dense output)."""

    def kernel(x_ref, wdw_ref, wpw_ref, bias_ref, o_ref):
        # x_ref:    (N, C_in, FLAT)   padded input, each plane flattened into lanes (VMEM)
        # wdw_ref:  (C_in, K*K)       depthwise weights (VMEM)
        # wpw_ref:  (C_out*C_in,)     pointwise weights with BN scale folded (SMEM)
        # bias_ref: (C_out,)          folded BN bias (SMEM)
        # o_ref:    (N, C_out, span)  dense stride-1 output, lane-major spatial (VMEM)

        # ReLU once over the whole padded slab (zero padding commutes with ReLU).
        xr = jnp.maximum(x_ref[...].astype(jnp.float32), 0.0)

        # Depthwise dilated conv: K*K statically unrolled lane-slice MACs.
        # acc[:, :, oh*Wp + ow] accumulates the tap sum for output pixel (oh, ow);
        # columns ow >= valid width are over-computed garbage discarded on host.
        wdw = wdw_ref[...].astype(jnp.float32)[None, :, :]      # (1, C_in, K*K), hoisted load
        acc = jnp.zeros((N, C_in, span), jnp.float32)
        for kh in range(K):
            for kw in range(K):
                base = kh * dilation * Wp + kw * dilation
                tap = kh * K + kw
                acc = acc + xr[:, :, base:base + span] * wdw[:, :, tap:tap + 1]

        # Pointwise 1x1 conv + folded BatchNorm as unrolled VPU FMAs on
        # lane-dense (N, span) slabs (channel counts far too small for the MXU).
        chans = [acc[:, ci, :] for ci in range(C_in)]           # hoisted channel slabs
        for co in range(C_out):
            y = jnp.full((N, span), bias_ref[co], jnp.float32)
            for ci in range(C_in):
                y = y + chans[ci] * wpw_ref[co * C_in + ci]
            o_ref[:, co, :] = y.astype(o_ref.dtype)

    return kernel


def dil_conv(x_nchw, w_dw, w_pw, gamma, beta, running_mean, running_var,
             *, stride=1, padding=2, dilation=2, eps=1e-5):
    """Pallas DilConv forward (inference-mode BatchNorm).

    x_nchw: (N, C_in, H, W)   input in PyTorch layout
    w_dw:   (C_in, K, K)      depthwise weights (PyTorch (C_in, 1, K, K) squeezed)
    w_pw:   (C_out, C_in)     1x1 pointwise weights (PyTorch (C_out, C_in, 1, 1) squeezed)
    gamma, beta, running_mean, running_var: (C_out,)  BatchNorm2d params / stats
    """
    N, C_in, H, W = x_nchw.shape
    C_out = w_pw.shape[0]
    K = w_dw.shape[-1]

    Hp, Wp = H + 2 * padding, W + 2 * padding
    reach = dilation * (K - 1)
    span_h = Hp - reach                    # dense stride-1 output rows
    span_w = Wp - reach                    # dense stride-1 output cols (valid)
    span = span_h * Wp                     # accumulator lanes per (n, c) plane
    max_base = reach * Wp + reach          # largest tap offset
    flat = max_base + span                 # needed flattened length (all taps in-bounds)
    flat_pad = -(-flat // 128) * 128       # round up to a lane-vreg multiple

    H_out = (H + 2 * padding - reach - 1) // stride + 1
    W_out = (W + 2 * padding - reach - 1) // stride + 1

    # Host-side layout plumbing (all cheap XLA ops, no transposes):
    #   zero-pad spatially, flatten each plane into the lane dim, pad lanes.
    x_pad = jnp.pad(x_nchw, ((0, 0), (0, 0), (padding, padding), (padding, padding)))
    x_flat = x_pad.reshape(N, C_in, Hp * Wp).astype(jnp.float32)
    x_flat = jnp.pad(x_flat, ((0, 0), (0, 0), (0, flat_pad - Hp * Wp)))

    # Depthwise weights (C_in, K*K).
    wdw_k = w_dw.reshape(C_in, K * K).astype(jnp.float32)

    # Fold BatchNorm (inference) into the pointwise weights + a per-channel bias.
    inv_std = 1.0 / jnp.sqrt(running_var + eps)
    scale = gamma * inv_std                                     # (C_out,)
    wpw_s = (w_pw * scale[:, None]).reshape(C_out * C_in).astype(jnp.float32)
    bias = (beta - running_mean * scale).astype(jnp.float32)    # (C_out,)

    kernel = _make_dilconv_kernel(N, C_in, C_out, K, dilation, Wp, span)

    out_flat = pl.pallas_call(
        kernel,
        out_shape=jax.ShapeDtypeStruct((N, C_out, span), x_nchw.dtype),
        in_specs=[
            pl.BlockSpec(memory_space=pltpu.MemorySpace.VMEM),   # x_flat
            pl.BlockSpec(memory_space=pltpu.MemorySpace.VMEM),   # depthwise weights
            pl.BlockSpec(memory_space=pltpu.MemorySpace.SMEM),   # pointwise*scale (scalars)
            pl.BlockSpec(memory_space=pltpu.MemorySpace.SMEM),   # bias (scalars)
        ],
        out_specs=pl.BlockSpec(memory_space=pltpu.MemorySpace.VMEM),
    )(x_flat, wdw_k, wpw_s, bias)

    # Recover NCHW: drop garbage columns and apply the conv stride (exact,
    # since stride-s conv == subsampled stride-1 conv and BN/1x1 are pointwise).
    out_full = out_flat.reshape(N, C_out, span_h, Wp)
    out = out_full[:, :,
                   0:(H_out - 1) * stride + 1:stride,
                   0:(W_out - 1) * stride + 1:stride]
    return out


def dil_conv_ref(x_nchw, w_dw, w_pw, gamma, beta, running_mean, running_var,
                 *, stride=1, padding=2, dilation=2, eps=1e-5):
    """Pure-JAX reference (XLA convs) matching the PyTorch module in eval mode."""
    C_in = x_nchw.shape[1]
    xr = jnp.maximum(x_nchw, 0.0)
    y = jax.lax.conv_general_dilated(
        xr, w_dw[:, None, :, :],
        window_strides=(stride, stride),
        padding=[(padding, padding), (padding, padding)],
        rhs_dilation=(dilation, dilation),
        dimension_numbers=("NCHW", "OIHW", "NCHW"),
        feature_group_count=C_in,
        precision=jax.lax.Precision.HIGHEST)
    y = jax.lax.conv_general_dilated(
        y, w_pw[:, :, None, None],
        window_strides=(1, 1),
        padding="VALID",
        dimension_numbers=("NCHW", "OIHW", "NCHW"),
        precision=jax.lax.Precision.HIGHEST)
    scale = gamma / jnp.sqrt(running_var + eps)
    bias = beta - running_mean * scale
    return y * scale[None, :, None, None] + bias[None, :, None, None]


if __name__ == "__main__":
    key = jax.random.PRNGKey(0)
    k1, k2, k3, k4, k5, k6, k7 = jax.random.split(key, 7)

    # Small shapes consistent with the SNAS dil_conv_3x3 op.
    N, C_in, H, W = 2, 4, 16, 16
    C_out, K = 4, 3
    stride, padding, dilation = 1, 2, 2

    x = jax.random.normal(k1, (N, C_in, H, W), dtype=jnp.float32)
    w_dw = 0.2 * jax.random.normal(k2, (C_in, K, K), dtype=jnp.float32)
    w_pw = 0.2 * jax.random.normal(k3, (C_out, C_in), dtype=jnp.float32)
    gamma = 1.0 + 0.1 * jax.random.normal(k4, (C_out,), dtype=jnp.float32)
    beta = 0.1 * jax.random.normal(k5, (C_out,), dtype=jnp.float32)
    running_mean = 0.1 * jax.random.normal(k6, (C_out,), dtype=jnp.float32)
    running_var = 1.0 + 0.1 * jnp.abs(jax.random.normal(k7, (C_out,), dtype=jnp.float32))

    out = dil_conv(x, w_dw, w_pw, gamma, beta, running_mean, running_var,
                   stride=stride, padding=padding, dilation=dilation)
    out = jax.block_until_ready(out)

    ref = dil_conv_ref(x, w_dw, w_pw, gamma, beta, running_mean, running_var,
                       stride=stride, padding=padding, dilation=dilation)
    ref = jax.block_until_ready(ref)

    assert out.shape == (N, C_out, H, W), out.shape
    np.testing.assert_allclose(np.asarray(out), np.asarray(ref), rtol=1e-3, atol=1e-3)

    print("KERNEL_OK")
</pallas_src>

<mosaic_0001>
module attributes {stable_mosaic.version = 11 : i64} {
  func.func @kernel(%arg0: memref<2x4x512xf32, #tpu.memory_space<vmem>>, %arg1: memref<4x9xf32, #tpu.memory_space<vmem>>, %arg2: memref<16xf32, #tpu.memory_space<smem>>, %arg3: memref<4xf32, #tpu.memory_space<smem>>, %arg4: memref<2x4x320xf32, #tpu.memory_space<vmem>>) attributes {dimension_semantics = [], scalar_prefetch = 0 : i64, scratch_operands = 0 : i64, tpu.core_type = #tpu.core_type<tc>} {
    %c0 = arith.constant 0 : index
    %c0_0 = arith.constant 0 : index
    %c0_1 = arith.constant 0 : index
    %0 = vector.load %arg0[%c0, %c0_0, %c0_1] : memref<2x4x512xf32, #tpu.memory_space<vmem>>, vector<2x4x512xf32>
    %cst = arith.constant 0.000000e+00 : f32
    %1 = vector.broadcast %cst : f32 to vector<2x4x512xf32>
    %2 = arith.maximumf %0, %1 : vector<2x4x512xf32>
    %c0_2 = arith.constant 0 : index
    %c0_3 = arith.constant 0 : index
    %3 = vector.load %arg1[%c0_2, %c0_3] : memref<4x9xf32, #tpu.memory_space<vmem>>, vector<4x9xf32>
    %4 = vector.shape_cast %3 : vector<4x9xf32> to vector<1x4x9xf32>
    %cst_4 = arith.constant 0.000000e+00 : f32
    %5 = vector.broadcast %cst_4 : f32 to vector<2x4x320xf32>
    %6 = vector.extract_strided_slice %2 {offsets = [0, 0, 0], sizes = [2, 4, 320], strides = [1, 1, 1]} : vector<2x4x512xf32> to vector<2x4x320xf32>
    %7 = vector.extract_strided_slice %4 {offsets = [0, 0, 0], sizes = [1, 4, 1], strides = [1, 1, 1]} : vector<1x4x9xf32> to vector<1x4x1xf32>
    %8 = vector.broadcast %7 : vector<1x4x1xf32> to vector<2x4x320xf32>
    %9 = arith.mulf %6, %8 : vector<2x4x320xf32>
    %10 = arith.addf %5, %9 : vector<2x4x320xf32>
    %11 = vector.extract_strided_slice %2 {offsets = [0, 0, 2], sizes = [2, 4, 320], strides = [1, 1, 1]} : vector<2x4x512xf32> to vector<2x4x320xf32>
    %12 = vector.extract_strided_slice %4 {offsets = [0, 0, 1], sizes = [1, 4, 1], strides = [1, 1, 1]} : vector<1x4x9xf32> to vector<1x4x1xf32>
    %13 = vector.broadcast %12 : vector<1x4x1xf32> to vector<2x4x320xf32>
    %14 = arith.mulf %11, %13 : vector<2x4x320xf32>
    %15 = arith.addf %10, %14 : vector<2x4x320xf32>
    %16 = vector.extract_strided_slice %2 {offsets = [0, 0, 4], sizes = [2, 4, 320], strides = [1, 1, 1]} : vector<2x4x512xf32> to vector<2x4x320xf32>
    %17 = vector.extract_strided_slice %4 {offsets = [0, 0, 2], sizes = [1, 4, 1], strides = [1, 1, 1]} : vector<1x4x9xf32> to vector<1x4x1xf32>
    %18 = vector.broadcast %17 : vector<1x4x1xf32> to vector<2x4x320xf32>
    %19 = arith.mulf %16, %18 : vector<2x4x320xf32>
    %20 = arith.addf %15, %19 : vector<2x4x320xf32>
    %21 = vector.extract_strided_slice %2 {offsets = [0, 0, 40], sizes = [2, 4, 320], strides = [1, 1, 1]} : vector<2x4x512xf32> to vector<2x4x320xf32>
    %22 = vector.extract_strided_slice %4 {offsets = [0, 0, 3], sizes = [1, 4, 1], strides = [1, 1, 1]} : vector<1x4x9xf32> to vector<1x4x1xf32>
    %23 = vector.broadcast %22 : vector<1x4x1xf32> to vector<2x4x320xf32>
    %24 = arith.mulf %21, %23 : vector<2x4x320xf32>
    %25 = arith.addf %20, %24 : vector<2x4x320xf32>
    %26 = vector.extract_strided_slice %2 {offsets = [0, 0, 42], sizes = [2, 4, 320], strides = [1, 1, 1]} : vector<2x4x512xf32> to vector<2x4x320xf32>
    %27 = vector.extract_strided_slice %4 {offsets = [0, 0, 4], sizes = [1, 4, 1], strides = [1, 1, 1]} : vector<1x4x9xf32> to vector<1x4x1xf32>
    %28 = vector.broadcast %27 : vector<1x4x1xf32> to vector<2x4x320xf32>
    %29 = arith.mulf %26, %28 : vector<2x4x320xf32>
    %30 = arith.addf %25, %29 : vector<2x4x320xf32>
    %31 = vector.extract_strided_slice %2 {offsets = [0, 0, 44], sizes = [2, 4, 320], strides = [1, 1, 1]} : vector<2x4x512xf32> to vector<2x4x320xf32>
    %32 = vector.extract_strided_slice %4 {offsets = [0, 0, 5], sizes = [1, 4, 1], strides = [1, 1, 1]} : vector<1x4x9xf32> to vector<1x4x1xf32>
    %33 = vector.broadcast %32 : vector<1x4x1xf32> to vector<2x4x320xf32>
    %34 = arith.mulf %31, %33 : vector<2x4x320xf32>
    %35 = arith.addf %30, %34 : vector<2x4x320xf32>
    %36 = vector.extract_strided_slice %2 {offsets = [0, 0, 80], sizes = [2, 4, 320], strides = [1, 1, 1]} : vector<2x4x512xf32> to vector<2x4x320xf32>
    %37 = vector.extract_strided_slice %4 {offsets = [0, 0, 6], sizes = [1, 4, 1], strides = [1, 1, 1]} : vector<1x4x9xf32> to vector<1x4x1xf32>
    %38 = vector.broadcast %37 : vector<1x4x1xf32> to vector<2x4x320xf32>
    %39 = arith.mulf %36, %38 : vector<2x4x320xf32>
    %40 = arith.addf %35, %39 : vector<2x4x320xf32>
    %41 = vector.extract_strided_slice %2 {offsets = [0, 0, 82], sizes = [2, 4, 320], strides = [1, 1, 1]} : vector<2x4x512xf32> to vector<2x4x320xf32>
    %42 = vector.extract_strided_slice %4 {offsets = [0, 0, 7], sizes = [1, 4, 1], strides = [1, 1, 1]} : vector<1x4x9xf32> to vector<1x4x1xf32>
    %43 = vector.broadcast %42 : vector<1x4x1xf32> to vector<2x4x320xf32>
    %44 = arith.mulf %41, %43 : vector<2x4x320xf32>
    %45 = arith.addf %40, %44 : vector<2x4x320xf32>
    %46 = vector.extract_strided_slice %2 {offsets = [0, 0, 84], sizes = [2, 4, 320], strides = [1, 1, 1]} : vector<2x4x512xf32> to vector<2x4x320xf32>
    %47 = vector.extract_strided_slice %4 {offsets = [0, 0, 8], sizes = [1, 4, 1], strides = [1, 1, 1]} : vector<1x4x9xf32> to vector<1x4x1xf32>
    %48 = vector.broadcast %47 : vector<1x4x1xf32> to vector<2x4x320xf32>
    %49 = arith.mulf %46, %48 : vector<2x4x320xf32>
    %50 = arith.addf %45, %49 : vector<2x4x320xf32>
    %51 = vector.extract_strided_slice %50 {offsets = [0, 0, 0], sizes = [2, 1, 320], strides = [1, 1, 1]} : vector<2x4x320xf32> to vector<2x1x320xf32>
    %52 = vector.shape_cast %51 : vector<2x1x320xf32> to vector<2x320xf32>
    %53 = vector.extract_strided_slice %50 {offsets = [0, 1, 0], sizes = [2, 1, 320], strides = [1, 1, 1]} : vector<2x4x320xf32> to vector<2x1x320xf32>
    %54 = vector.shape_cast %53 : vector<2x1x320xf32> to vector<2x320xf32>
    %55 = vector.extract_strided_slice %50 {offsets = [0, 2, 0], sizes = [2, 1, 320], strides = [1, 1, 1]} : vector<2x4x320xf32> to vector<2x1x320xf32>
    %56 = vector.shape_cast %55 : vector<2x1x320xf32> to vector<2x320xf32>
    %57 = vector.extract_strided_slice %50 {offsets = [0, 3, 0], sizes = [2, 1, 320], strides = [1, 1, 1]} : vector<2x4x320xf32> to vector<2x1x320xf32>
    %58 = vector.shape_cast %57 : vector<2x1x320xf32> to vector<2x320xf32>
    %c0_5 = arith.constant 0 : index
    %59 = memref.load %arg3[%c0_5] : memref<4xf32, #tpu.memory_space<smem>>
    %60 = vector.broadcast %59 : f32 to vector<2x320xf32>
    %c0_6 = arith.constant 0 : index
    %61 = memref.load %arg2[%c0_6] : memref<16xf32, #tpu.memory_space<smem>>
    %62 = vector.broadcast %61 : f32 to vector<2x320xf32>
    %63 = arith.mulf %52, %62 : vector<2x320xf32>
    %64 = arith.addf %60, %63 : vector<2x320xf32>
    %c1 = arith.constant 1 : index
    %65 = memref.load %arg2[%c1] : memref<16xf32, #tpu.memory_space<smem>>
    %66 = vector.broadcast %65 : f32 to vector<2x320xf32>
    %67 = arith.mulf %54, %66 : vector<2x320xf32>
    %68 = arith.addf %64, %67 : vector<2x320xf32>
    %c2 = arith.constant 2 : index
    %69 = memref.load %arg2[%c2] : memref<16xf32, #tpu.memory_space<smem>>
    %70 = vector.broadcast %69 : f32 to vector<2x320xf32>
    %71 = arith.mulf %56, %70 : vector<2x320xf32>
    %72 = arith.addf %68, %71 : vector<2x320xf32>
    %c3 = arith.constant 3 : index
    %73 = memref.load %arg2[%c3] : memref<16xf32, #tpu.memory_space<smem>>
    %74 = vector.broadcast %73 : f32 to vector<2x320xf32>
    %75 = arith.mulf %58, %74 : vector<2x320xf32>
    %76 = arith.addf %72, %75 : vector<2x320xf32>
    %c0_7 = arith.constant 0 : index
    %c0_8 = arith.constant 0 : index
    %c0_9 = arith.constant 0 : index
    %77 = vector.load %arg4[%c0_7, %c0_8, %c0_9] : memref<2x4x320xf32, #tpu.memory_space<vmem>>, vector<2x1x320xf32>
    %78 = vector.shape_cast %77 : vector<2x1x320xf32> to vector<2x320xf32>
    %79 = vector.shape_cast %76 : vector<2x320xf32> to vector<2x1x320xf32>
    tpu.vector_store %arg4[%c0_7, %c0_8, %c0_9], %79 {strides = array<i32>} : memref<2x4x320xf32, #tpu.memory_space<vmem>>, vector<2x1x320xf32>,
    %c1_10 = arith.constant 1 : index
    %80 = memref.load %arg3[%c1_10] : memref<4xf32, #tpu.memory_space<smem>>
    %81 = vector.broadcast %80 : f32 to vector<2x320xf32>
    %c4 = arith.constant 4 : index
    %82 = memref.load %arg2[%c4] : memref<16xf32, #tpu.memory_space<smem>>
    %83 = vector.broadcast %82 : f32 to vector<2x320xf32>
    %84 = arith.mulf %52, %83 : vector<2x320xf32>
    %85 = arith.addf %81, %84 : vector<2x320xf32>
    %c5 = arith.constant 5 : index
    %86 = memref.load %arg2[%c5] : memref<16xf32, #tpu.memory_space<smem>>
    %87 = vector.broadcast %86 : f32 to vector<2x320xf32>
    %88 = arith.mulf %54, %87 : vector<2x320xf32>
    %89 = arith.addf %85, %88 : vector<2x320xf32>
    %c6 = arith.constant 6 : index
    %90 = memref.load %arg2[%c6] : memref<16xf32, #tpu.memory_space<smem>>
    %91 = vector.broadcast %90 : f32 to vector<2x320xf32>
    %92 = arith.mulf %56, %91 : vector<2x320xf32>
    %93 = arith.addf %89, %92 : vector<2x320xf32>
    %c7 = arith.constant 7 : index
    %94 = memref.load %arg2[%c7] : memref<16xf32, #tpu.memory_space<smem>>
    %95 = vector.broadcast %94 : f32 to vector<2x320xf32>
    %96 = arith.mulf %58, %95 : vector<2x320xf32>
    %97 = arith.addf %93, %96 : vector<2x320xf32>
    %c0_11 = arith.constant 0 : index
    %c1_12 = arith.constant 1 : index
    %c0_13 = arith.constant 0 : index
    %98 = vector.load %arg4[%c0_11, %c1_12, %c0_13] : memref<2x4x320xf32, #tpu.memory_space<vmem>>, vector<2x1x320xf32>
    %99 = vector.shape_cast %98 : vector<2x1x320xf32> to vector<2x320xf32>
    %100 = vector.shape_cast %97 : vector<2x320xf32> to vector<2x1x320xf32>
    tpu.vector_store %arg4[%c0_11, %c1_12, %c0_13], %100 {strides = array<i32>} : memref<2x4x320xf32, #tpu.memory_space<vmem>>, vector<2x1x320xf32>,
    %c2_14 = arith.constant 2 : index
    %101 = memref.load %arg3[%c2_14] : memref<4xf32, #tpu.memory_space<smem>>
    %102 = vector.broadcast %101 : f32 to vector<2x320xf32>
    %c8 = arith.constant 8 : index
    %103 = memref.load %arg2[%c8] : memref<16xf32, #tpu.memory_space<smem>>
    %104 = vector.broadcast %103 : f32 to vector<2x320xf32>
    %105 = arith.mulf %52, %104 : vector<2x320xf32>
    %106 = arith.addf %102, %105 : vector<2x320xf32>
    %c9 = arith.constant 9 : index
    %107 = memref.load %arg2[%c9] : memref<16xf32, #tpu.memory_space<smem>>
    %108 = vector.broadcast %107 : f32 to vector<2x320xf32>
    %109 = arith.mulf %54, %108 : vector<2x320xf32>
    %110 = arith.addf %106, %109 : vector<2x320xf32>
    %c10 = arith.constant 10 : index
    %111 = memref.load %arg2[%c10] : memref<16xf32, #tpu.memory_space<smem>>
    %112 = vector.broadcast %111 : f32 to vector<2x320xf32>
    %113 = arith.mulf %56, %112 : vector<2x320xf32>
    %114 = arith.addf %110, %113 : vector<2x320xf32>
    %c11 = arith.constant 11 : index
    %115 = memref.load %arg2[%c11] : memref<16xf32, #tpu.memory_space<smem>>
    %116 = vector.broadcast %115 : f32 to vector<2x320xf32>
    %117 = arith.mulf %58, %116 : vector<2x320xf32>
    %118 = arith.addf %114, %117 : vector<2x320xf32>
    %c0_15 = arith.constant 0 : index
    %c2_16 = arith.constant 2 : index
    %c0_17 = arith.constant 0 : index
    %119 = vector.load %arg4[%c0_15, %c2_16, %c0_17] : memref<2x4x320xf32, #tpu.memory_space<vmem>>, vector<2x1x320xf32>
    %120 = vector.shape_cast %119 : vector<2x1x320xf32> to vector<2x320xf32>
    %121 = vector.shape_cast %118 : vector<2x320xf32> to vector<2x1x320xf32>
    tpu.vector_store %arg4[%c0_15, %c2_16, %c0_17], %121 {strides = array<i32>} : memref<2x4x320xf32, #tpu.memory_space<vmem>>, vector<2x1x320xf32>,
    %c3_18 = arith.constant 3 : index
    %122 = memref.load %arg3[%c3_18] : memref<4xf32, #tpu.memory_space<smem>>
    %123 = vector.broadcast %122 : f32 to vector<2x320xf32>
    %c12 = arith.constant 12 : index
    %124 = memref.load %arg2[%c12] : memref<16xf32, #tpu.memory_space<smem>>
    %125 = vector.broadcast %124 : f32 to vector<2x320xf32>
    %126 = arith.mulf %52, %125 : vector<2x320xf32>
    %127 = arith.addf %123, %126 : vector<2x320xf32>
    %c13 = arith.constant 13 : index
    %128 = memref.load %arg2[%c13] : memref<16xf32, #tpu.memory_space<smem>>
    %129 = vector.broadcast %128 : f32 to vector<2x320xf32>
    %130 = arith.mulf %54, %129 : vector<2x320xf32>
    %131 = arith.addf %127, %130 : vector<2x320xf32>
    %c14 = arith.constant 14 : index
    %132 = memref.load %arg2[%c14] : memref<16xf32, #tpu.memory_space<smem>>
    %133 = vector.broadcast %132 : f32 to vector<2x320xf32>
    %134 = arith.mulf %56, %133 : vector<2x320xf32>
    %135 = arith.addf %131, %134 : vector<2x320xf32>
    %c15 = arith.constant 15 : index
    %136 = memref.load %arg2[%c15] : memref<16xf32, #tpu.memory_space<smem>>
    %137 = vector.broadcast %136 : f32 to vector<2x320xf32>
    %138 = arith.mulf %58, %137 : vector<2x320xf32>
    %139 = arith.addf %135, %138 : vector<2x320xf32>
    %c0_19 = arith.constant 0 : index
    %c3_20 = arith.constant 3 : index
    %c0_21 = arith.constant 0 : index
    %140 = vector.load %arg4[%c0_19, %c3_20, %c0_21] : memref<2x4x320xf32, #tpu.memory_space<vmem>>, vector<2x1x320xf32>
    %141 = vector.shape_cast %140 : vector<2x1x320xf32> to vector<2x320xf32>
    %142 = vector.shape_cast %139 : vector<2x320xf32> to vector<2x1x320xf32>
    tpu.vector_store %arg4[%c0_19, %c3_20, %c0_21], %142 {strides = array<i32>} : memref<2x4x320xf32, #tpu.memory_space<vmem>>, vector<2x1x320xf32>,
    return
  }
}

</mosaic_0001>

<bundles_post_ra>
// kernel: tpu_custom_call.1
= control target key start
LH: loop header
LB: loop body
LE: loop exit
PB: predicated region body
PF: predicated region fallthrough
CT: control target
= control target key end

     0   :  { %9 = vsyncpa [#allocation3], 0  ;;  %s1838_s0 = inlined_call_operand.hbm [shape: f32[2,4,512], index: 0, kind: input, shape index: {}]   ;;  %s1839_s1 = inlined_call_operand.hbm [shape: f32[4,9], index: 1, kind: input, shape index: {}]   ;;  %s1840_s2 = inlined_call_operand.vmem [shape: f32[16], index: 2, kind: input, shape index: {}]   ;;  %s1841_s3 = inlined_call_operand.vmem [shape: f32[4], index: 3, kind: input, shape index: {}]   ;;  %s1842_s4 = inlined_call_operand.hbm [shape: f32[2,4,320], index: 4, kind: output, shape index: {}]  }
   0x1   :  { %10 = vsyncpa [#allocation7], 0 }
   0x2   :  { %11 = vsyncpa [#allocation5], 0 }
   0x3   :  { %12 = vsyncpa [#allocation10], 0 }
   0x4   :  { %13 = vsyncpa [#allocation4], 0  ;;  %s1260_s15 = smov [#allocation2]   ;;  %s1160_s19 = scalar_lea.hbm %s1838_s0, 512 }
   0x5   :  { %s19_s16 = sshll.u32 %s1260_s15, 4  ;;  %p1161_p0 = scmp.ne.s32.totalorder %s1838_s0, %s1160_s19  ;;  %s20_s16 = int_to_ptr.vmem [resolvable:$true] %s19_s16 }
   0x6   :  { %p1164_p1 = scmp.lt.u32.totalorder %s1160_s19, %s1838_s0 }
   0x8   :  { %p1166_p2 = pnand %p1164_p1, %p1161_p0 }
   0xa   :  { %1169 = shalt.err (!%p1166_p2)
}
   0xb   :  { %s1170_s24 = scalar_lea.vmem %s20_s16, 512  ;;  %p1175_p4 = scmp.lt.s32.totalorder %s20_s16, %s20_s16 }
   0xc   :  { %p1171_p3 = scmp.ne.s32.totalorder %s20_s16, %s1170_s24  ;;  %p1176_p5 = scmp.lt.s32.totalorder %s1170_s24, %s1170_s24 }
   0xe   :  { %p1177_p6 = por %p1176_p5, %p1175_p4 }
  0x10   :  { %p1178_p7 = pnand %p1177_p6, %p1171_p3 }
  0x12   :  { %1181 = shalt.err (!%p1178_p7)
}
  0x13   :  { %s1261_s25 = smov 256   ;;  %s1262_s26 = smov 16  }
  0x14   :  { %25 = dma.hbm_to_vmem [thread:$0]  %s1838_s0, 512, %s20_s16, [#allocation3], %s1261_s25, %s1261_s25, %s1262_s26  }
  0x15   :  { %s1263_s29 = smov [#allocation6]   ;;  %s42_s7 = sshll.u32 %s1840_s2, 4  ;;  %s43_s7 = int_to_ptr.vmem [resolvable:$true] %s42_s7 }
  0x16   :  { %s32_s30 = sshll.u32 %s1263_s29, 4  ;;  %s1182_s10 = scalar_lea.hbm %s1839_s1, 64  ;;  %s33_s30 = int_to_ptr.vmem [resolvable:$true] %s32_s30 }
  0x17   :  { %p1183_p8 = scmp.ne.s32.totalorder %s1839_s1, %s1182_s10  ;;  %p1186_p9 = scmp.lt.u32.totalorder %s1182_s10, %s1839_s1 }
  0x19   :  { %p1188_p10 = pnand %p1186_p9, %p1183_p8 }
  0x1b   :  { %1191 = shalt.err (!%p1188_p10)
}
  0x1c   :  { %s1192_s0 = scalar_lea.vmem %s33_s30, 64  ;;  %p1197_p12 = scmp.lt.s32.totalorder %s33_s30, %s33_s30 }
  0x1d   :  { %p1193_p11 = scmp.ne.s32.totalorder %s33_s30, %s1192_s0  ;;  %p1198_p13 = scmp.lt.s32.totalorder %s1192_s0, %s1192_s0 }
  0x1f   :  { %p1199_p0 = por %p1198_p13, %p1197_p12 }
  0x21   :  { %p1200_p1 = pnand %p1199_p0, %p1193_p11 }
  0x23   :  { %1203 = shalt.err (!%p1200_p1)
}
  0x24   :  { %35 = dma.hbm_to_vmem [thread:$0]  %s1839_s1, 64, %s33_s30, [#allocation7]  }
  0x25   :  { %s52_s18 = sshll.u32 %s1841_s3, 4  ;;  %s1204_s19 = scalar_lea.vmem %s43_s7, 16  ;;  %s53_s18 = int_to_ptr.vmem [resolvable:$true] %s52_s18 }
  0x26   :  { %p1205_p2 = scmp.ne.s32.totalorder %s43_s7, %s1204_s19  ;;  %p1209_p3 = scmp.lt.s32.totalorder %s43_s7, %s43_s7 }
  0x27   :  { %p1210_p4 = scmp.lt.s32.totalorder %s1204_s19, %s1204_s19 }
  0x29   :  { %p1211_p5 = por %p1210_p4, %p1209_p3 }
  0x2b   :  { %p1212_p6 = pnand %p1211_p5, %p1205_p2 }
  0x2d   :  { %1215 = shalt.err (!%p1212_p6)
}
  0x2e   :  { %s1264_s20 = smov [#allocation8]   ;;  %s1216_s21 = scalar_lea.vmem %s53_s18, 16 }
  0x2f   :  { %45 = dma.vmem_to_smem %s43_s7, 16, %s1264_s20, [#allocation5]  }
  0x30   :  { %p1217_p7 = scmp.ne.s32.totalorder %s53_s18, %s1216_s21  ;;  %p1221_p8 = scmp.lt.s32.totalorder %s53_s18, %s53_s18 }
  0x31   :  { %p1222_p9 = scmp.lt.s32.totalorder %s1216_s21, %s1216_s21 }
  0x33   :  { %p1223_p10 = por %p1222_p9, %p1221_p8 }
  0x35   :  { %p1224_p11 = pnand %p1223_p10, %p1217_p7 }
  0x37   :  { %1227 = shalt.err (!%p1224_p11)
}
  0x38   :  { %s1265_s1 = smov [#allocation9]  }
  0x39   :  { %55 = dma.vmem_to_smem %s53_s18, 16, %s1265_s1, [#allocation10]  }
  0x3a   :  { %1250 = dma.done.wait [#allocation3], 512  }
  0x3b   :  { %1251 = vsyncadd [#allocation3], 4294966784 }
  0x3c   :  { %1252 = dma.done.wait [#allocation7], 64  }
  0x3d   :  { %1253 = vsyncadd [#allocation7], 4294967232 }
  0x3e   :  { %1254 = dma.done.wait [#allocation5], 16  }
  0x3f   :  { %1255 = vsyncadd [#allocation5], 4294967280 }
  0x40   :  { %1256 = dma.done.wait [#allocation10], 16  }
  0x41   :  { %1257 = vsyncadd [#allocation10], 4294967280 }
  0x42   :  { %68 = sfence }
  0x43   :  { %v77_v0 = vld [vmem:[#allocation6] sm:$0xf]  ;;  %v1266_v1 = vmov 1   ;;  %v1267_v2 = vmov 3   ;;  %v1268_v3 = vmov 2   ;;  %v1269_v4 = vmov 4  }
  0x44   :  { %1150 = vset.pattern.permute.xlu0 %v1266_v1  ;;  %1152 = vset.pattern.permute.xlu1 %v1267_v2  ;;  %v1270_v5 = vmov 5   ;;  %v1271_v6 = vmov 6   ;;  %v1272_v7 = vmov 7   ;;  %v1273_v8 = vmov 0   ;;  %v71_v15 = vld [vmem:[#allocation2 + $0x10] sm:$0xff]  ;;  %v69_v16 = vld [vmem:[#allocation2] sm:$0xff] }
  0x45   :  { %99 = vperm.xlu0 %1150, %v77_v0   ;;  %188 = vperm.xlu1 %1152, %v77_v0   ;;  %v1274_v9 = vmov 8   ;;  %v1275_v10 = vmov 839922192   ;;  %v85_v12 = vlaneseq  ;;  %v1349_v18 = vmax.f32 %v71_v15, 0.0  ;;  %v70_v21 = vld [vmem:[#allocation2 + $0x8] sm:$0xff]  ;;  %v72_v26 = vld [vmem:[#allocation2 + $0x18] sm:$0xff] }
  0x46   :  { %v83_v11 = vunpack.c.l.s4 %v1275_v10  ;;  %v1351_v19 = vmax.f32 %v69_v16, 0.0  ;;  %v1356_v25 = vmax.f32 %v70_v21, 0.0  ;;  %s1276_s3 = smov 126   ;;  %v1360_v30 = vmax.f32 %v72_v26, 0.0  ;;  %s1277_s22 = smov 124  }
  0x47   :  { %v1344_v14 = vshrl.u32 %v85_v12, 7  ;;  %s1278_s23 = smov 88   ;;  %s1279_s24 = smov 86   ;;  %vm129_vm0 = vcmask 1043456   ;;  %vm131_vm1 = vcmask 1031168   ;;  %vm175_vm2 = vcmask 1014784  }
  0x48   :  { %v84_v13 = vunpack.c.0.s8 %v83_v11  ;;  %s1280_s25 = smov 84   ;;  %s1281_s26 = smov 48   ;;  %vm219_vm3 = vcmask 719872   ;;  %vm263_vm4 = vcmask 703488   ;;  %vm307_vm5 = vcmask 687104  }
  0x49   :  { %1151 = vset.pattern.permute.xlu0 %v1268_v3  ;;  %1153 = vset.pattern.permute.xlu1 %v1269_v4  ;;  %s1282_s27 = smov 46   ;;  %s1283_s28 = smov 44   ;;  %vm351_vm6 = vcmask 392192   ;;  %vm397_vm7 = vcmask 375808   ;;  %vm443_vm8 = vcmask 359424   ;;  %vm1674_vm9 = vcmp.lt.s32.totalorder %v85_v12, 320 }
  0x4a   :  { %144 = vperm.xlu0 %1151, %v77_v0   ;;  %232 = vperm.xlu1 %1153, %v77_v0   ;;  %v1347_v17 = vsub.s32 %v84_v13, %v1344_v14  ;;  %s459_s29 = sld [smem:[#allocation8]]  ;;  %s1056_s30 = sld [smem:[#allocation8 + $0x1]] }
  0x4b   :  { %s1061_s5 = sld [smem:[#allocation8 + $0x2]]  ;;  %s457_s6 = sld [smem:[#allocation9]] }
  0x4c   :  { %s1066_s7 = sld [smem:[#allocation8 + $0x3]]  ;;  %s1442_s8 = sld [smem:[#allocation9 + $0x1]] }
  0x4d   :  { %s1072_s9 = sld [smem:[#allocation8 + $0x4]]  ;;  %s1444_s10 = sld [smem:[#allocation8 + $0x5]] }
  0x4e   :  { %1154 = vset.pattern.permute.xlu1 %v1270_v5  ;;  %1155 = vset.pattern.permute.xlu0 %v1271_v6  ;;  %s1446_s11 = sld [smem:[#allocation8 + $0x6]]  ;;  %s1450_s12 = sld [smem:[#allocation8 + $0x7]] }
  0x4f   :  { %276 = vperm.xlu1 %1154, %v77_v0   ;;  %320 = vperm.xlu0 %1155, %v77_v0   ;;  %s1452_s13 = sld [smem:[#allocation8 + $0x8]]  ;;  %s1456_s14 = sld [smem:[#allocation9 + $0x2]] }
  0x50   :  { %s1458_s0 = sld [smem:[#allocation8 + $0x9]]  ;;  %s1460_s2 = sld [smem:[#allocation8 + $0xa]] }
  0x51   :  { %s1462_s15 = sld [smem:[#allocation8 + $0xb]]  ;;  %s1470_s16 = sld [smem:[#allocation8 + $0xc]] }
  0x52   :  { %s1481_s17 = sld [smem:[#allocation9 + $0x3]]  ;;  %s1518_s18 = sld [smem:[#allocation8 + $0xd]] }
  0x53   :  { %1156 = vset.pattern.permute.xlu1 %v1272_v7  ;;  %1158 = vset.pattern.permute.xlu0 %v1273_v8  ;;  %s1587_s19 = sld [smem:[#allocation8 + $0xe]]  ;;  %s1598_s20 = sld [smem:[#allocation8 + $0xf]] }
  0x54   :  { %366 = vperm.xlu1 %1156, %v77_v0   ;;  %80 = vperm.xlu0 %1158, %v77_v0   ;;  %s1285_s21 = smov [#allocation11]  }
  0x55   :  { %s1041_s1 = sshll.u32 %s1285_s21, 4  ;;  %s1042_s1 = int_to_ptr.vmem [resolvable:$true] %s1041_s1 }
  0x56   :  { %p1233_p13 = scmp.lt.s32.totalorder %s1042_s1, %s1042_s1 }
  0x58   :  { %1157 = vset.pattern.permute.xlu1 %v1274_v9  ;;  %1159 = vset.pattern.permute.xlu0 %v1274_v9 }
  0x59   :  { %412 = vperm.xlu1 %1157, %v77_v0  }
  0xc4   :  { %v100_v20 = vpop.permute.xlu0 %99  ;;  %v189_v31 = vpop.permute.xlu1 %188 }
  0xc5   :  { %v107_v22 = vrot.slane %v100_v20, %v1347_v17  ;;  %v196_v33 = vrot.slane %v189_v31, %v1347_v17 }
  0xc7   :  { %v111_v23 = vmul.f32 %v107_v22, %v1349_v18  ;;  %v109_v24 = vmul.f32 %v107_v22, %v1351_v19  ;;  %v110_v29 = vmul.f32 %v107_v22, %v1356_v25  ;;  %v112_v35 = vmul.f32 %v107_v22, %v1360_v30 }
  0xc8   :  { %v198_v38 = vmul.f32 %v196_v33, %v1351_v19  ;;  %v200_v44 = vmul.f32 %v196_v33, %v1349_v18  ;;  %v199_v49 = vmul.f32 %v196_v33, %v1356_v25  ;;  %v201_v54 = vmul.f32 %v196_v33, %v1360_v30 }
  0xc9   :  { %121 = vrot.lane.b32.xlu0 %v111_v23, %s1276_s3  ;;  %117 = vrot.lane.b32.xlu1 %v109_v24, %s1276_s3  ;;  %v145_v27 = vpop.permute.xlu0 %144  ;;  %v233_v39 = vpop.permute.xlu1 %232 }
  0xca   :  { %v152_v28 = vrot.slane %v145_v27, %v1347_v17  ;;  %v240_v43 = vrot.slane %v233_v39, %v1347_v17 }
  0xcc   :  { %v154_v32 = vmul.f32 %v152_v28, %v1351_v19  ;;  %v156_v34 = vmul.f32 %v152_v28, %v1349_v18  ;;  %v155_v37 = vmul.f32 %v152_v28, %v1356_v25  ;;  %v157_v42 = vmul.f32 %v152_v28, %v1360_v30 }
  0xcd   :  { %119 = vrot.lane.b32.xlu1 %v110_v29, %s1276_s3  ;;  %v242_v50 = vmul.f32 %v240_v43, %v1351_v19  ;;  %v244_v53 = vmul.f32 %v240_v43, %v1349_v18  ;;  %v243_v55 = vmul.f32 %v240_v43, %v1356_v25  ;;  %v245_v59 = vmul.f32 %v240_v43, %v1360_v30 }
  0xce   :  { %162 = vrot.lane.b32.xlu0 %v154_v32, %s1277_s22  ;;  %v321_v36 = vpop.permute.xlu0 %320  ;;  %v277_v51 = vpop.permute.xlu1 %276  ;;  %v1477_v43 = vstv %s1056_s30 }
  0xcf   :  { %v284_v52 = vrot.slane %v277_v51, %v1347_v17  ;;  %v328_v57 = vrot.slane %v321_v36, %v1347_v17  ;;  %v1488_v51 = vstv %s1072_s9 }
  0xd1   :  { %123 = vrot.lane.b32.xlu1 %v112_v35, %s1276_s3  ;;  %v286_v56 = vmul.f32 %v284_v52, %v1351_v19  ;;  %v288_v58 = vmul.f32 %v284_v52, %v1349_v18  ;;  %v287_v60 = vmul.f32 %v284_v52, %v1356_v25  ;;  %v330_v61 = vmul.f32 %v328_v57, %v1351_v19  ;;  %s1228_s3 = scalar_lea.vmem %s1042_s1, 384 }
  0xd2   :  { %166 = vrot.lane.b32.xlu0 %v156_v34, %s1277_s22  ;;  %v332_v0 = vmul.f32 %v328_v57, %v1349_v18  ;;  %v289_v1 = vmul.f32 %v284_v52, %v1360_v30  ;;  %v331_v2 = vmul.f32 %v328_v57, %v1356_v25  ;;  %v333_v7 = vmul.f32 %v328_v57, %v1360_v30  ;;  %p1229_p12 = scmp.ne.s32.totalorder %s1042_s1, %s1228_s3  ;;  %p1234_p0 = scmp.lt.s32.totalorder %s1228_s3, %s1228_s3 }
  0xd3   :  { %v81_v40 = vpop.permute.xlu0 %80  ;;  %v367_v62 = vpop.permute.xlu1 %366 }
  0xd4   :  { %v88_v41 = vrot.slane %v81_v40, %v1347_v17  ;;  %v374_v63 = vrot.slane %v367_v62, %v1347_v17  ;;  %p1235_p1 = por %p1234_p0, %p1233_p13 }
  0xd5   :  { %164 = vrot.lane.b32.xlu1 %v155_v37, %s1277_s22 }
  0xd6   :  { %206 = vrot.lane.b32.xlu0 %v198_v38, %s1278_s23  ;;  %v1373_v45 = vmul.f32 %v88_v41, %v1351_v19  ;;  %v1376_v46 = vmul.f32 %v88_v41, %v1349_v18  ;;  %v1379_v47 = vmul.f32 %v88_v41, %v1356_v25  ;;  %v1382_v48 = vmul.f32 %v88_v41, %v1360_v30  ;;  %p1236_p2 = pnand %p1235_p1, %p1229_p12 }
  0xd7   :  { %v376_v3 = vmul.f32 %v374_v63, %v1351_v19  ;;  %v378_v6 = vmul.f32 %v374_v63, %v1349_v18  ;;  %v377_v8 = vmul.f32 %v374_v63, %v1356_v25  ;;  %v379_v11 = vmul.f32 %v374_v63, %v1360_v30 }
  0xd8   :  { %v413_v4 = vpop.permute.xlu1 %412  ;;  %v1510_v63 = vstv %s1450_s12 }
  0xd9   :  { %168 = vrot.lane.b32.xlu1 %v157_v42, %s1277_s22  ;;  %v420_v5 = vrot.slane %v413_v4, %v1347_v17  ;;  %v1475_v42 = vstv %s459_s29  ;;  %v1525_v4 = vstv %s1460_s2 }
  0xda   :  { %210 = vrot.lane.b32.xlu0 %v200_v44, %s1278_s23 }
  0xdb   :  { %v422_v9 = vmul.f32 %v420_v5, %v1351_v19  ;;  %v424_v10 = vmul.f32 %v420_v5, %v1349_v18  ;;  %v423_v13 = vmul.f32 %v420_v5, %v1356_v25  ;;  %v425_v15 = vmul.f32 %v420_v5, %v1360_v30 }
  0xdc   :  { %v1284_v30 = vmov 1966171168   ;;  %v1528_v5 = vstv %s1462_s15 }
  0xdd   :  { %208 = vrot.lane.b32.xlu1 %v199_v49, %s1278_s23  ;;  %v552_v31 = vunpack.c.l.s4 %v1284_v30  ;;  %v1484_v49 = vstv %s457_s6  ;;  %v1540_v30 = vstv %s1470_s16 }
  0xde   :  { %250 = vrot.lane.b32.xlu0 %v242_v50, %s1279_s24  ;;  %v1486_v50 = vstv %s1066_s7 }
  0xdf   :  { %v553_v34 = vunpack.c.0.s8 %v552_v31 }
  0xe1   :  { %212 = vrot.lane.b32.xlu1 %v201_v54, %s1278_s23  ;;  %v1465_v37 = vsub.s32 %v553_v34, %v1344_v14  ;;  %v1479_v14 = vstv %s1061_s5 }
  0xe2   :  { %254 = vrot.lane.b32.xlu0 %v244_v53, %s1279_s24 }
  0xe5   :  { %252 = vrot.lane.b32.xlu1 %v243_v55, %s1279_s24  ;;  %v1494_v55 = vstv %s1442_s8 }
  0xe6   :  { %294 = vrot.lane.b32.xlu0 %v286_v56, %s1280_s25 }
  0xe9   :  { %256 = vrot.lane.b32.xlu1 %v245_v59, %s1279_s24  ;;  %v1501_v59 = vstv %s1444_s10 }
  0xea   :  { %298 = vrot.lane.b32.xlu0 %v288_v58, %s1280_s25 }
  0xed   :  { %296 = vrot.lane.b32.xlu1 %v287_v60, %s1280_s25  ;;  %v1504_v60 = vstv %s1446_s11 }
  0xee   :  { %338 = vrot.lane.b32.xlu0 %v330_v61, %s1281_s26 }
  0xf1   :  { %300 = vrot.lane.b32.xlu1 %v289_v1, %s1280_s25  ;;  %v1516_v1 = vstv %s1452_s13 }
  0xf2   :  { %342 = vrot.lane.b32.xlu0 %v332_v0, %s1281_s26  ;;  %v1513_v0 = vstv %s1456_s14 }
  0xf5   :  { %340 = vrot.lane.b32.xlu1 %v331_v2, %s1281_s26 }
  0xf6   :  { %384 = vrot.lane.b32.xlu0 %v376_v3, %s1282_s27  ;;  %v1522_v3 = vstv %s1458_s0 }
  0xf9   :  { %344 = vrot.lane.b32.xlu1 %v333_v7, %s1281_s26 }
  0xfa   :  { %388 = vrot.lane.b32.xlu0 %v378_v6, %s1282_s27 }
  0xfd   :  { %386 = vrot.lane.b32.xlu1 %v377_v8, %s1282_s27 }
  0xfe   :  { %430 = vrot.lane.b32.xlu0 %v422_v9, %s1283_s28 }
 0x101   :  { %390 = vrot.lane.b32.xlu1 %v379_v11, %s1282_s27 }
 0x102   :  { %434 = vrot.lane.b32.xlu0 %v424_v10, %s1283_s28 }
 0x105   :  { %432 = vrot.lane.b32.xlu1 %v423_v13, %s1283_s28 }
 0x109   :  { %436 = vrot.lane.b32.xlu1 %v425_v15, %s1283_s28 }
 0x13b   :  { %v1410_v16 = vpop.permute.xlu1 %117  ;;  %v1412_v17 = vpop.permute.xlu0 %121 }
 0x13c   :  { %v125_v44 = vrot.slane %v1410_v16, 4  ;;  %v127_v52 = vrot.slane %v1412_v17, 4 }
 0x13f   :  { %v1414_v19 = vpop.permute.xlu1 %119 }
 0x140   :  { %v1416_v20 = vpop.permute.xlu0 %162  ;;  %v126_v38 = vrot.slane %v1414_v19, 4 }
 0x141   :  { %v170_v53 = vrot.slane %v1416_v20, 4 }
 0x142   :  { %v130_v56 = vsel %vm129_vm0, %v125_v44, %v126_v38 }
 0x143   :  { %v1418_v21 = vpop.permute.xlu1 %123  ;;  %v132_v6 = vsel %vm131_vm1, %v1410_v16, %v130_v56  ;;  %v140_v16 = vadd.f32 %v1414_v19, %v1379_v47 }
 0x144   :  { %v1420_v18 = vpop.permute.xlu0 %166  ;;  %v128_v40 = vrot.slane %v1418_v21, 4  ;;  %v142_v19 = vadd.f32 %v1418_v21, %v1382_v48 }
 0x145   :  { %v172_v2 = vrot.slane %v1420_v18, 4 }
 0x146   :  { %v133_v61 = vsel %vm129_vm0, %v127_v52, %v128_v40  ;;  %v1549_v40 = vstv %s1481_s17 }
 0x147   :  { %v1422_v22 = vpop.permute.xlu1 %164  ;;  %v134_v10 = vsel %vm131_vm1, %v1412_v17, %v133_v61  ;;  %v139_v17 = vadd.f32 %v132_v6, %v1373_v45 }
 0x148   :  { %v1424_v23 = vpop.permute.xlu0 %206  ;;  %v171_v54 = vrot.slane %v1422_v22, 4  ;;  %v141_v47 = vadd.f32 %v134_v10, %v1376_v46  ;;  %v184_v46 = vadd.f32 %v1422_v22, %v140_v16 }
 0x149   :  { %v214_v8 = vrot.slane %v1424_v23, 4 }
 0x14a   :  { %v174_v7 = vsel %vm129_vm0, %v170_v53, %v171_v54 }
 0x14b   :  { %v1426_v24 = vpop.permute.xlu1 %168  ;;  %v176_v44 = vsel %vm175_vm2, %v1416_v20, %v174_v7  ;;  %v1569_v7 = vstv %s1518_s18 }
 0x14c   :  { %v1428_v25 = vpop.permute.xlu0 %210  ;;  %v173_v57 = vrot.slane %v1426_v24, 4  ;;  %v183_v6 = vadd.f32 %v176_v44, %v139_v17 }
 0x14d   :  { %v216_v52 = vrot.slane %v1428_v25, 4 }
 0x14e   :  { %v177_v11 = vsel %vm129_vm0, %v172_v2, %v173_v57 }
 0x14f   :  { %v1430_v26 = vpop.permute.xlu1 %208  ;;  %v178_v54 = vsel %vm175_vm2, %v1420_v18, %v177_v11 }
 0x150   :  { %v1432_v27 = vpop.permute.xlu0 %250  ;;  %v215_v9 = vrot.slane %v1430_v26, 4  ;;  %v185_v18 = vadd.f32 %v178_v54, %v141_v47 }
 0x151   :  { %v258_v31 = vrot.slane %v1432_v27, 4 }
 0x152   :  { %v218_v56 = vsel %vm129_vm0, %v214_v8, %v215_v9  ;;  %v186_v8 = vadd.f32 %v1426_v24, %v142_v19 }
 0x153   :  { %v1434_v28 = vpop.permute.xlu1 %212  ;;  %v220_v9 = vsel %vm219_vm3, %v1424_v23, %v218_v56 }
 0x154   :  { %v1436_v29 = vpop.permute.xlu0 %254  ;;  %v217_v13 = vrot.slane %v1434_v28, 4  ;;  %v227_v47 = vadd.f32 %v220_v9, %v183_v6  ;;  %v230_v19 = vadd.f32 %v1434_v28, %v186_v8 }
 0x155   :  { %v260_v57 = vrot.slane %v1436_v29, 4 }
 0x156   :  { %v221_v45 = vsel %vm129_vm0, %v216_v52, %v217_v13 }
 0x157   :  { %v1438_v32 = vpop.permute.xlu1 %252  ;;  %v222_v11 = vsel %vm219_vm3, %v1428_v25, %v221_v45 }
 0x158   :  { %v1440_v33 = vpop.permute.xlu0 %294  ;;  %v259_v34 = vrot.slane %v1438_v32, 4 }
 0x159   :  { %v302_v20 = vrot.slane %v1440_v33, 4 }
 0x15a   :  { %v262_v48 = vsel %vm129_vm0, %v258_v31, %v259_v34  ;;  %v228_v31 = vadd.f32 %v1430_v26, %v184_v46  ;;  %v229_v26 = vadd.f32 %v222_v11, %v185_v18 }
 0x15b   :  { %v1448_v35 = vpop.permute.xlu1 %256  ;;  %v264_v34 = vsel %vm263_vm4, %v1432_v27, %v262_v48 }
 0x15c   :  { %v1454_v36 = vpop.permute.xlu0 %298  ;;  %v261_v53 = vrot.slane %v1448_v35, 4  ;;  %v272_v27 = vadd.f32 %v1438_v32, %v228_v31  ;;  %v274_v46 = vadd.f32 %v1448_v35, %v230_v19 }
 0x15d   :  { %v304_v24 = vrot.slane %v1454_v36, 4 }
 0x15e   :  { %v265_v10 = vsel %vm129_vm0, %v260_v57, %v261_v53 }
 0x15f   :  { %v1468_v39 = vpop.permute.xlu1 %296  ;;  %v266_v44 = vsel %vm263_vm4, %v1436_v29, %v265_v10 }
 0x160   :  { %v1473_v41 = vpop.permute.xlu0 %338  ;;  %v303_v61 = vrot.slane %v1468_v39, 4  ;;  %v316_v9 = vadd.f32 %v1468_v39, %v272_v27 }
 0x161   :  { %v346_v13 = vrot.slane %v1473_v41, 4 }
 0x162   :  { %v306_v17 = vsel %vm129_vm0, %v302_v20, %v303_v61  ;;  %v271_v20 = vadd.f32 %v264_v34, %v227_v47  ;;  %v273_v61 = vadd.f32 %v266_v44, %v229_v26  ;;  %v1616_v44 = vstv %s1587_s19 }
 0x163   :  { %v1498_v58 = vpop.permute.xlu1 %300  ;;  %v308_v54 = vsel %vm307_vm5, %v1440_v33, %v306_v17 }
 0x164   :  { %v1507_v62 = vpop.permute.xlu0 %342  ;;  %v305_v22 = vrot.slane %v1498_v58, 4  ;;  %v315_v8 = vadd.f32 %v308_v54, %v271_v20 }
 0x165   :  { %v348_v45 = vrot.slane %v1507_v62, 4 }
 0x166   :  { %v309_v56 = vsel %vm129_vm0, %v304_v24, %v305_v22 }
 0x167   :  { %v341_v15 = vpop.permute.xlu1 %340  ;;  %v310_v10 = vsel %vm307_vm5, %v1454_v36, %v309_v56  ;;  %v1626_v56 = vstv %s1598_s20 }
 0x168   :  { %v1546_v38 = vpop.permute.xlu0 %384  ;;  %v347_v16 = vrot.slane %v341_v15, 4  ;;  %v317_v24 = vadd.f32 %v310_v10, %v273_v61 }
 0x169   :  { %v392_v25 = vrot.slane %v1546_v38, 4 }
 0x16a   :  { %v350_v29 = vsel %vm129_vm0, %v346_v13, %v347_v16  ;;  %v353_v6 = vsel %vm351_vm6, %v341_v15, %v347_v16  ;;  %v318_v16 = vadd.f32 %v1498_v58, %v274_v46 }
 0x16b   :  { %v345_v2 = vpop.permute.xlu1 %344  ;;  %v352_v35 = vsel %vm351_vm6, %v1473_v41, %v350_v29  ;;  %v362_v31 = vadd.f32 %v353_v6, %v316_v9 }
 0x16c   :  { %v389_v21 = vpop.permute.xlu0 %388  ;;  %v349_v52 = vrot.slane %v345_v2, 4  ;;  %v361_v17 = vadd.f32 %v352_v35, %v315_v8 }
 0x16d   :  { %v394_v32 = vrot.slane %v389_v21, 4 }
 0x16e   :  { %v354_v28 = vsel %vm129_vm0, %v348_v45, %v349_v52  ;;  %v356_v15 = vsel %vm351_vm6, %v345_v2, %v349_v52 }
 0x16f   :  { %v387_v23 = vpop.permute.xlu1 %386  ;;  %v355_v39 = vsel %vm351_vm6, %v1507_v62, %v354_v28 }
 0x170   :  { %v393_v53 = vrot.slane %v387_v23, 4  ;;  %v431_v57 = vpop.permute.xlu0 %430 }
 0x171   :  { %v438_v13 = vrot.slane %v431_v57, 4 }
 0x172   :  { %v396_v33 = vsel %vm129_vm0, %v392_v25, %v393_v53  ;;  %v399_v11 = vsel %vm397_vm7, %v387_v23, %v393_v53  ;;  %v364_v23 = vadd.f32 %v356_v15, %v318_v16  ;;  %v363_v53 = vadd.f32 %v355_v39, %v317_v24 }
 0x173   :  { %v391_v48 = vpop.permute.xlu1 %390  ;;  %v398_v34 = vsel %vm397_vm7, %v1546_v38, %v396_v33  ;;  %v408_v25 = vadd.f32 %v399_v11, %v362_v31 }
 0x174   :  { %v395_v18 = vrot.slane %v391_v48, 4  ;;  %v435_v41 = vpop.permute.xlu0 %434  ;;  %v407_v47 = vadd.f32 %v398_v34, %v361_v17 }
 0x175   :  { %v440_v26 = vrot.slane %v435_v41, 4 }
 0x176   :  { %v400_v22 = vsel %vm129_vm0, %v394_v32, %v395_v18  ;;  %v402_v58 = vsel %vm397_vm7, %v391_v48, %v395_v18 }
 0x177   :  { %v433_v36 = vpop.permute.xlu1 %432  ;;  %v401_v52 = vsel %vm397_vm7, %v389_v21, %v400_v22  ;;  %v410_v29 = vadd.f32 %v402_v58, %v364_v23 }
 0x178   :  { %v439_v2 = vrot.slane %v433_v36, 4  ;;  %v409_v45 = vadd.f32 %v401_v52, %v363_v53 }
 0x17a   :  { %v442_v62 = vsel %vm129_vm0, %v438_v13, %v439_v2  ;;  %v445_v38 = vsel %vm443_vm8, %v433_v36, %v439_v2 }
 0x17b   :  { %v444_v19 = vsel %vm443_vm8, %v431_v57, %v442_v62  ;;  %v1623_v27 = vadd.f32 %v445_v38, %v408_v25  ;;  %v437_v54 = vpop.permute.xlu1 %436 }
 0x17c   :  { %v1628_v20 = vadd.f32 %v444_v19, %v407_v47  ;;  %v441_v21 = vrot.slane %v437_v54, 4 }
 0x17d   :  { %v462_v61 = vmul.f32 %v1475_v42, %v1623_v27  ;;  %v472_v46 = vmul.f32 %v1477_v43, %v1623_v27  ;;  %v498_v6 = vmul.f32 %v1479_v14, %v1623_v27  ;;  %v524_v57 = vmul.f32 %v1486_v50, %v1623_v27 }
 0x17e   :  { %v446_v48 = vsel %vm129_vm0, %v440_v26, %v441_v21  ;;  %v448_v28 = vsel %vm443_vm8, %v437_v54, %v441_v21  ;;  %v461_v32 = vmul.f32 %v1475_v42, %v1628_v20  ;;  %v471_v33 = vmul.f32 %v1477_v43, %v1628_v20 }
 0x17f   :  { %v447_v18 = vsel %vm443_vm8, %v435_v41, %v446_v48  ;;  %v1645_v8 = vadd.f32 %v448_v28, %v410_v29  ;;  %v466_v9 = vadd.f32 %v462_v61, %v1484_v49  ;;  %v1058_v10 = vrot.slane %v472_v46, 9 }
 0x180   :  { %v1648_v35 = vadd.f32 %v447_v18, %v409_v45  ;;  %v465_v15 = vadd.f32 %v461_v32, %v1484_v49  ;;  %v1057_v11 = vrot.slane %v471_v33, 9  ;;  %v497_v13 = vmul.f32 %v1479_v14, %v1628_v20 }
 0x181   :  { %v464_v22 = vmul.f32 %v1475_v42, %v1645_v8  ;;  %v474_v16 = vmul.f32 %v1477_v43, %v1645_v8  ;;  %v492_v31 = vadd.f32 %v1058_v10, %v466_v9  ;;  %v500_v39 = vmul.f32 %v1479_v14, %v1645_v8 }
 0x182   :  { %v463_v34 = vmul.f32 %v1475_v42, %v1648_v35  ;;  %v473_v36 = vmul.f32 %v1477_v43, %v1648_v35  ;;  %v491_v24 = vadd.f32 %v1057_v11, %v465_v15  ;;  %v499_v17 = vmul.f32 %v1479_v14, %v1648_v35 }
 0x183   :  { %v468_v41 = vadd.f32 %v464_v22, %v1484_v49  ;;  %v1060_v2 = vrot.slane %v474_v16, 9  ;;  %v1062_v23 = vrot.slane %v497_v13, 10  ;;  %v1063_v25 = vrot.slane %v498_v6, 10 }
 0x184   :  { %v467_v52 = vadd.f32 %v463_v34, %v1484_v49  ;;  %v1059_v58 = vrot.slane %v473_v36, 9  ;;  %v1064_v53 = vrot.slane %v499_v17, 10  ;;  %v1065_v47 = vrot.slane %v500_v39, 10 }
 0x185   :  { %v494_v62 = vadd.f32 %v1060_v2, %v468_v41  ;;  %v517_v38 = vadd.f32 %v1062_v23, %v491_v24  ;;  %v518_v42 = vadd.f32 %v1063_v25, %v492_v31  ;;  %v523_v43 = vmul.f32 %v1486_v50, %v1628_v20 }
 0x186   :  { %v493_v26 = vadd.f32 %v1059_v58, %v467_v52  ;;  %v525_v14 = vmul.f32 %v1486_v50, %v1648_v35  ;;  %v526_v19 = vmul.f32 %v1486_v50, %v1645_v8  ;;  %v1068_v54 = vrot.slane %v524_v57, 11 }
 0x187   :  { %v520_v45 = vadd.f32 %v1065_v47, %v494_v62  ;;  %v1067_v29 = vrot.slane %v523_v43, 11  ;;  %v608_v21 = vmul.f32 %v1488_v51, %v1628_v20  ;;  %v609_v61 = vmul.f32 %v1488_v51, %v1623_v27 }
 0x188   :  { %v519_v46 = vadd.f32 %v1064_v53, %v493_v26  ;;  %v1069_v6 = vrot.slane %v525_v14, 11  ;;  %v1070_v48 = vrot.slane %v526_v19, 11  ;;  %v544_v28 = vadd.f32 %v1068_v54, %v518_v42 }
 0x189   :  { %v543_v32 = vadd.f32 %v1067_v29, %v517_v38  ;;  %v610_v50 = vmul.f32 %v1488_v51, %v1648_v35  ;;  %v611_v12 = vmul.f32 %v1488_v51, %v1645_v8  ;;  %v612_v57 = vadd.f32 %v608_v21, %v1494_v55 }
 0x18a   :  { %v545_v33 = vadd.f32 %v1069_v6, %v519_v46  ;;  %v546_v18 = vadd.f32 %v1070_v48, %v520_v45  ;;  %v564_v9 = vrot.slane %v544_v28, %v1465_v37  ;;  %v613_v10 = vadd.f32 %v609_v61, %v1494_v55 }
 0x18b   :  { %v557_v15 = vrot.slane %v543_v32, %v1465_v37  ;;  %v614_v11 = vadd.f32 %v610_v50, %v1494_v55  ;;  %v615_v13 = vadd.f32 %v611_v12, %v1494_v55  ;;  %v618_v22 = vmul.f32 %v1501_v59, %v1628_v20 }
 0x18c   :  { %v579_v16 = vrot.slane %v545_v33, %v1465_v37  ;;  %v586_v51 = vrot.slane %v546_v18, %v1465_v37  ;;  %v619_v31 = vmul.f32 %v1501_v59, %v1623_v27  ;;  %v620_v39 = vmul.f32 %v1501_v59, %v1648_v35 }
 0x18d   :  { %v565_v34 = vcombine.low %v557_v15, %v564_v9  ;;  %v621_v36 = vmul.f32 %v1501_v59, %v1645_v8  ;;  %v1074_v24 = vrot.slane %v618_v22, 9  ;;  %v644_v55 = vmul.f32 %v1504_v60, %v1628_v20 }
 0x18e   :  { %v587_v17 = vcombine.low %v579_v16, %v586_v51  ;;  %v1075_v41 = vrot.slane %v619_v31, 9  ;;  %v1076_v2 = vrot.slane %v620_v39, 9  ;;  %v645_v23 = vmul.f32 %v1504_v60, %v1623_v27 }
 0x18f   :  { %v572_v25 = vrot.slane %v565_v34, %v1465_v37  ;;  %v1077_v52 = vrot.slane %v621_v36, 9  ;;  %v638_v58 = vadd.f32 %v1074_v24, %v612_v57  ;;  %v646_v53 = vmul.f32 %v1504_v60, %v1648_v35 }
 0x190   :  { %v594_v47 = vrot.slane %v587_v17, %v1465_v37  ;;  %v639_v59 = vadd.f32 %v1075_v41, %v613_v10  ;;  %v640_v62 = vadd.f32 %v1076_v2, %v614_v11  ;;  %v647_v38 = vmul.f32 %v1504_v60, %v1645_v8 }
 0x191   :  { %601 = vst.msk [vmem:[#allocation11] ss:$4 sm:$0x7] %vm1674_vm9, %v572_v25  ;;  %v641_v42 = vadd.f32 %v1077_v52, %v615_v13  ;;  %v1079_v43 = vrot.slane %v644_v55, 10  ;;  %v1080_v26 = vrot.slane %v645_v23, 10  ;;  %v1081_v14 = vrot.slane %v646_v53, 10 }
 0x192   :  { %603 = vst.msk [vmem:[#allocation11 + $0xc] ss:$4 sm:$0x7] %vm1674_vm9, %v594_v47  ;;  %v1082_v19 = vrot.slane %v647_v38, 10  ;;  %v670_v54 = vmul.f32 %v1510_v63, %v1628_v20  ;;  %v671_v45 = vmul.f32 %v1510_v63, %v1623_v27  ;;  %v672_v60 = vmul.f32 %v1510_v63, %v1648_v35 }
 0x193   :  { %v664_v29 = vadd.f32 %v1079_v43, %v638_v58  ;;  %v665_v21 = vadd.f32 %v1080_v26, %v639_v59  ;;  %v666_v61 = vadd.f32 %v1081_v14, %v640_v62  ;;  %v673_v46 = vmul.f32 %v1510_v63, %v1645_v8 }
 0x194   :  { %v667_v6 = vadd.f32 %v1082_v19, %v641_v42  ;;  %v1084_v48 = vrot.slane %v670_v54, 11  ;;  %v1085_v28 = vrot.slane %v671_v45, 11  ;;  %v1086_v32 = vrot.slane %v672_v60, 11 }
 0x195   :  { %v1087_v50 = vrot.slane %v673_v46, 11  ;;  %v752_v12 = vmul.f32 %v1516_v1, %v1628_v20  ;;  %v753_v57 = vmul.f32 %v1516_v1, %v1623_v27  ;;  %v754_v33 = vmul.f32 %v1516_v1, %v1648_v35 }
 0x196   :  { %v690_v18 = vadd.f32 %v1084_v48, %v664_v29  ;;  %v691_v9 = vadd.f32 %v1085_v28, %v665_v21  ;;  %v692_v10 = vadd.f32 %v1086_v32, %v666_v61  ;;  %v755_v63 = vmul.f32 %v1516_v1, %v1645_v8 }
 0x197   :  { %v693_v15 = vadd.f32 %v1087_v50, %v667_v6  ;;  %v756_v11 = vadd.f32 %v752_v12, %v1513_v0  ;;  %v757_v13 = vadd.f32 %v753_v57, %v1513_v0  ;;  %v758_v22 = vadd.f32 %v754_v33, %v1513_v0 }
 0x198   :  { %v704_v16 = vrot.slane %v690_v18, %v1465_v37  ;;  %v711_v51 = vrot.slane %v691_v9, %v1465_v37  ;;  %v726_v31 = vrot.slane %v692_v10, %v1465_v37  ;;  %v759_v39 = vadd.f32 %v755_v63, %v1513_v0 }
 0x199   :  { %v733_v34 = vrot.slane %v693_v15, %v1465_v37  ;;  %v762_v1 = vmul.f32 %v1522_v3, %v1628_v20  ;;  %v763_v36 = vmul.f32 %v1522_v3, %v1623_v27  ;;  %v764_v24 = vmul.f32 %v1522_v3, %v1648_v35 }
 0x19a   :  { %v712_v55 = vcombine.low %v704_v16, %v711_v51  ;;  %v765_v17 = vmul.f32 %v1522_v3, %v1645_v8  ;;  %v788_v41 = vmul.f32 %v1525_v4, %v1628_v20  ;;  %v789_v0 = vmul.f32 %v1525_v4, %v1623_v27 }
 0x19b   :  { %v734_v2 = vcombine.low %v726_v31, %v733_v34  ;;  %v1091_v23 = vrot.slane %v762_v1, 9  ;;  %v1092_v25 = vrot.slane %v763_v36, 9  ;;  %v1093_v52 = vrot.slane %v764_v24, 9 }
 0x19c   :  { %v719_v58 = vrot.slane %v712_v55, %v1465_v37  ;;  %v1094_v53 = vrot.slane %v765_v17, 9  ;;  %v790_v47 = vmul.f32 %v1525_v4, %v1648_v35  ;;  %v791_v59 = vmul.f32 %v1525_v4, %v1645_v8 }
 0x19d   :  { %v741_v3 = vrot.slane %v734_v2, %v1465_v37  ;;  %v782_v62 = vadd.f32 %v1091_v23, %v756_v11  ;;  %v783_v38 = vadd.f32 %v1092_v25, %v757_v13  ;;  %v784_v42 = vadd.f32 %v1093_v52, %v758_v22 }
 0x19e   :  { %745 = vst.msk [vmem:[#allocation11 + $0x1] ss:$4 sm:$0x7] %vm1674_vm9, %v719_v58  ;;  %v785_v43 = vadd.f32 %v1094_v53, %v759_v39  ;;  %v1096_v26 = vrot.slane %v788_v41, 10  ;;  %v1097_v14 = vrot.slane %v789_v0, 10  ;;  %v1098_v19 = vrot.slane %v790_v47, 10 }
 0x19f   :  { %747 = vst.msk [vmem:[#allocation11 + $0xd] ss:$4 sm:$0x7] %vm1674_vm9, %v741_v3  ;;  %v1099_v54 = vrot.slane %v791_v59, 10  ;;  %v814_v45 = vmul.f32 %v1528_v5, %v1628_v20  ;;  %v815_v4 = vmul.f32 %v1528_v5, %v1623_v27  ;;  %v816_v60 = vmul.f32 %v1528_v5, %v1648_v35 }
 0x1a0   :  { %v808_v29 = vadd.f32 %v1096_v26, %v782_v62  ;;  %v809_v21 = vadd.f32 %v1097_v14, %v783_v38  ;;  %v810_v61 = vadd.f32 %v1098_v19, %v784_v42  ;;  %v817_v46 = vmul.f32 %v1528_v5, %v1645_v8 }
 0x1a1   :  { %v811_v6 = vadd.f32 %v1099_v54, %v785_v43  ;;  %v1101_v48 = vrot.slane %v814_v45, 11  ;;  %v1102_v28 = vrot.slane %v815_v4, 11  ;;  %v1103_v32 = vrot.slane %v816_v60, 11 }
 0x1a2   :  { %v1104_v50 = vrot.slane %v817_v46, 11  ;;  %v896_v12 = vmul.f32 %v1540_v30, %v1628_v20  ;;  %v897_v57 = vmul.f32 %v1540_v30, %v1623_v27  ;;  %v898_v33 = vmul.f32 %v1540_v30, %v1648_v35 }
 0x1a3   :  { %v834_v18 = vadd.f32 %v1101_v48, %v808_v29  ;;  %v835_v9 = vadd.f32 %v1102_v28, %v809_v21  ;;  %v836_v10 = vadd.f32 %v1103_v32, %v810_v61  ;;  %v899_v5 = vmul.f32 %v1540_v30, %v1645_v8 }
 0x1a4   :  { %v837_v63 = vadd.f32 %v1104_v50, %v811_v6  ;;  %v900_v15 = vadd.f32 %v896_v12, %v1549_v40  ;;  %v901_v11 = vadd.f32 %v897_v57, %v1549_v40  ;;  %v902_v13 = vadd.f32 %v898_v33, %v1549_v40 }
 0x1a5   :  { %v848_v22 = vrot.slane %v834_v18, %v1465_v37  ;;  %v855_v16 = vrot.slane %v835_v9, %v1465_v37  ;;  %v870_v51 = vrot.slane %v836_v10, %v1465_v37  ;;  %v903_v31 = vadd.f32 %v899_v5, %v1549_v40 }
 0x1a6   :  { %v877_v39 = vrot.slane %v837_v63, %v1465_v37  ;;  %v906_v30 = vmul.f32 %v1569_v7, %v1628_v20  ;;  %v907_v34 = vmul.f32 %v1569_v7, %v1623_v27  ;;  %v908_v1 = vmul.f32 %v1569_v7, %v1648_v35 }
 0x1a7   :  { %v856_v36 = vcombine.low %v848_v22, %v855_v16  ;;  %v909_v24 = vmul.f32 %v1569_v7, %v1645_v8  ;;  %v932_v55 = vmul.f32 %v1616_v44, %v1628_v20  ;;  %v933_v40 = vmul.f32 %v1616_v44, %v1623_v27 }
 0x1a8   :  { %v878_v17 = vcombine.low %v870_v51, %v877_v39  ;;  %v1108_v41 = vrot.slane %v906_v30, 9  ;;  %v1109_v0 = vrot.slane %v907_v34, 9  ;;  %v1110_v2 = vrot.slane %v908_v1, 9 }
 0x1a9   :  { %v863_v23 = vrot.slane %v856_v36, %v1465_v37  ;;  %v1111_v25 = vrot.slane %v909_v24, 9  ;;  %v934_v52 = vmul.f32 %v1616_v44, %v1648_v35  ;;  %v935_v58 = vmul.f32 %v1616_v44, %v1645_v8 }
 0x1aa   :  { %v885_v7 = vrot.slane %v878_v17, %v1465_v37  ;;  %v926_v53 = vadd.f32 %v1108_v41, %v900_v15  ;;  %v927_v47 = vadd.f32 %v1109_v0, %v901_v11  ;;  %v928_v59 = vadd.f32 %v1110_v2, %v902_v13 }
 0x1ab   :  { %889 = vst.msk [vmem:[#allocation11 + $0x2] ss:$4 sm:$0x7] %vm1674_vm9, %v863_v23  ;;  %v929_v3 = vadd.f32 %v1111_v25, %v903_v31  ;;  %v1113_v62 = vrot.slane %v932_v55, 10  ;;  %v1114_v38 = vrot.slane %v933_v40, 10  ;;  %v1115_v42 = vrot.slane %v934_v52, 10 }
 0x1ac   :  { %891 = vst.msk [vmem:[#allocation11 + $0xe] ss:$4 sm:$0x7] %vm1674_vm9, %v885_v7  ;;  %v1116_v43 = vrot.slane %v935_v58, 10  ;;  %v958_v26 = vmul.f32 %v1626_v56, %v1628_v20  ;;  %v959_v44 = vmul.f32 %v1626_v56, %v1623_v27  ;;  %v960_v14 = vmul.f32 %v1626_v56, %v1648_v35 }
 0x1ad   :  { %v952_v19 = vadd.f32 %v1113_v62, %v926_v53  ;;  %v953_v54 = vadd.f32 %v1114_v38, %v927_v47  ;;  %v954_v45 = vadd.f32 %v1115_v42, %v928_v59  ;;  %v961_v4 = vmul.f32 %v1626_v56, %v1645_v8 }
 0x1ae   :  { %v955_v60 = vadd.f32 %v1116_v43, %v929_v3  ;;  %v1118_v29 = vrot.slane %v958_v26, 11  ;;  %v1119_v21 = vrot.slane %v959_v44, 11  ;;  %v1120_v61 = vrot.slane %v960_v14, 11 }
 0x1af   :  { %v1121_v46 = vrot.slane %v961_v4, 11 }
 0x1b0   :  { %v978_v6 = vadd.f32 %v1118_v29, %v952_v19  ;;  %v979_v48 = vadd.f32 %v1119_v21, %v953_v54  ;;  %v980_v20 = vadd.f32 %v1120_v61, %v954_v45 }
 0x1b1   :  { %v981_v28 = vadd.f32 %v1121_v46, %v955_v60 }
 0x1b2   :  { %v992_v27 = vrot.slane %v978_v6, %v1465_v37  ;;  %v999_v32 = vrot.slane %v979_v48, %v1465_v37  ;;  %v1014_v35 = vrot.slane %v980_v20, %v1465_v37 }
 0x1b3   :  { %v1021_v50 = vrot.slane %v981_v28, %v1465_v37 }
 0x1b4   :  { %v1000_v12 = vcombine.low %v992_v27, %v999_v32 }
 0x1b5   :  { %v1022_v56 = vcombine.low %v1014_v35, %v1021_v50 }
 0x1b6   :  { %v1007_v8 = vrot.slane %v1000_v12, %v1465_v37 }
 0x1b7   :  { %v1029_v57 = vrot.slane %v1022_v56, %v1465_v37 }
 0x1b8   :  { %1033 = vst.msk [vmem:[#allocation11 + $0x3] ss:$4 sm:$0x7] %vm1674_vm9, %v1007_v8 }
 0x1b9   :  { %1035 = vst.msk [vmem:[#allocation11 + $0xf] ss:$4 sm:$0x7] %vm1674_vm9, %v1029_v57 }
 0x1ba   :  { %1239 = shalt.err (!%p1236_p2)
}
 0x1bb   :  { %s1240_s24 = scalar_lea.hbm %s1842_s4, 384 }
 0x1bc   :  { %p1241_p3 = scmp.ne.s32.totalorder %s1842_s4, %s1240_s24  ;;  %p1244_p4 = scmp.lt.u32.totalorder %s1240_s24, %s1842_s4 }
 0x1be   :  { %p1246_p5 = pnand %p1244_p4, %p1241_p3 }
 0x1c0   :  { %1249 = shalt.err (!%p1246_p5)
}
 0x1c1   :  { %s1286_s29 = smov 192   ;;  %s1287_s30 = smov 12  }
 0x1c2   :  { %1047 = dma.vmem_to_hbm [thread:$0]  %s1042_s1, 384, %s1842_s4, [#allocation4], %s1286_s29, %s1286_s29, %s1287_s30  }
 0x1c3   :  { %1258 = dma.done.wait [#allocation4], 384  }
 0x1c4   :  { %1259 = vsyncadd [#allocation4], 4294966912 }
 0x1c5   :  { %1051 = vsyncpa [#allocation3], 1 }
 0x1c6   :  { %1052 = vsyncpa [#allocation7], 1 }
 0x1c7   :  { %1053 = vsyncpa [#allocation4], 1 }
 0x1c8   :  { %1054 = vsyncpa [#allocation5], 1 }
 0x1c9   :  { %1055 = vsyncpa [#allocation10], 1 }

</bundles_post_ra>
